<compile_context>
chip_gen: v7x
topology: tpu7x:2x2x1
jax: 0.10.0
libtpu: 0.0.40
codegen_flags: <defaults>
</compile_context>

<pallas_src>
import jax
import jax.numpy as jnp
from jax import lax
from jax.experimental import pallas as pl
from jax.experimental.pallas import tpu as pltpu

LOWER_BOUND = 1e-4  # GreaterThan(0.0001)


# --------------------------------------------------------------------------- #
# Kernel
# --------------------------------------------------------------------------- #
def _make_hetero_noise_kernel(multi_col: bool):
    """Build the kernel.  multi_col=False is the row-slab fast path (one
    full-width column block per row tile): no on/off-diagonal branching."""

    def kernel(b_ref, x_ref, w_ref, out_ref):
        # b_ref: (1,) SMEM   x_ref: (TB, TR, D) VMEM   w_ref: (1, D) VMEM
        # out_ref: (TB, TR, TC) VMEM
        _, tr, tc = out_ref.shape
        row0 = pl.program_id(1) * tr
        col0 = pl.program_id(2) * tc

        def write_diag_tile():
            x = x_ref[...]                                   # (TB, TR, D)
            w = w_ref[...]                                   # (1, D) broadcasts
            # noise_model mean: VPU mul + lane reduce (no MXU for 1-col matvec)
            mean = jnp.sum(x * w, axis=-1, keepdims=True) + b_ref[0]  # (TB,TR,1)
            # GreaterThan(1e-4): stable softplus + lower bound
            noise_diag = jnp.logaddexp(mean, 0.0) + LOWER_BOUND       # (TB,TR,1)
            # diag_embed restricted to this tile (global row == global col)
            row = lax.broadcasted_iota(jnp.int32, (tr, 1), 0) + row0
            col = lax.broadcasted_iota(jnp.int32, (1, tc), 1) + col0
            mask = (row == col)[None]                        # (1, TR, TC)
            out_ref[...] = jnp.where(mask, noise_diag, 0.0).astype(out_ref.dtype)

        if multi_col:
            # Rare fallback (enormous N): zero-fill off-diagonal tiles only.
            on_diag = jnp.logical_and(row0 < col0 + tc, col0 < row0 + tr)

            @pl.when(jnp.logical_not(on_diag))
            def _():
                out_ref[...] = jnp.zeros_like(out_ref)

            pl.when(on_diag)(write_diag_tile)
        else:
            write_diag_tile()

    return kernel


# --------------------------------------------------------------------------- #
# Tile / VMEM-budget selection
# --------------------------------------------------------------------------- #
def _round_up(n, m):
    return ((n + m - 1) // m) * m


def _vmem_capacity_bytes(default=64 * 1024 * 1024):
    try:
        info = pltpu.get_tpu_info()
        cap = getattr(info, "vmem_capacity_bytes", None)
        if cap:
            return int(cap)
    except Exception:
        pass
    return default  # conservative (v7x-sized) fallback


def _select_tiles(B, N, D):
    """Generation-aware tile selection.

    Returns (TB, TR, TC, vmem_limit_bytes).  TC == N (row slab) unless a
    minimal 8-row full-width slab would not fit one output buffer."""
    vmem_cap = _vmem_capacity_bytes()
    # 96 MiB on v5e/v6e (128 MiB physical), 48 MiB on v7x (64 MiB physical).
    vmem_limit = min((vmem_cap * 3) // 4, 96 * 1024 * 1024)
    out_buf_budget = vmem_limit // 5  # one output buffer (double-buffered + x)

    # Column tile: prefer full width (lane-dense row slab).
    if 8 * N * 4 <= out_buf_budget:
        TC = N
    else:
        TC = 2048  # lane-dense fallback for enormous N (cdiv-padded edges)

    # Row tile: largest multiple of 8, capped at 512, fitting the budget.
    TR = min(512, _round_up(N, 8))
    while TR > 8 and TR * TC * 4 > out_buf_budget:
        TR //= 2
    TR = max(8, TR)
    if TR >= N:
        TR = N  # full extent is always a legal block dim

    # Batch folding only when one (TR, TC) tile already covers all of (N, N);
    # amortizes per-step overhead for tiny problems.
    TB = 1
    if TR >= N and TC >= N:
        per_batch = (N * N + N * D) * 4
        TB = max(1, min(B, out_buf_budget // max(per_batch, 1)))
        # Keep >= 2 grid steps along a "parallel" axis when possible so both
        # v7x TensorCores get work.
        if B >= 2:
            TB = min(TB, max(1, pl.cdiv(B, 2)))
    return TB, TR, TC, vmem_limit


# --------------------------------------------------------------------------- #
# Wrapper
# --------------------------------------------------------------------------- #
def _diag_embed_xla(x, w, b):
    """Plain-XLA path (used for tiny N, where a Pallas launch buys nothing)."""
    mean = jnp.einsum("bnd,d->bn", x, w) + b
    noise_diag = jax.nn.softplus(mean) + LOWER_BOUND
    B, N = noise_diag.shape
    out = jnp.zeros((B, N, N), jnp.float32)
    idx = jnp.arange(N)
    return out.at[:, idx, idx].set(noise_diag)


def heteroskedastic_noise(x, w, b, *, min_pallas_n=128):
    """x: (B, N, D) f32, w: (D,) f32, b: scalar f32  ->  (B, N, N) f32."""
    B, N, D = x.shape
    if N < min_pallas_n:
        # Sub-128-lane outputs force masked partial stores and the launch is
        # dominated by fixed overhead -- plain XLA is at least as good here.
        return _diag_embed_xla(x.astype(jnp.float32), w.astype(jnp.float32), b)

    TB, TR, TC, vmem_limit = _select_tiles(B, N, D)

    w2 = w.reshape(1, D).astype(jnp.float32)
    b1 = jnp.asarray(b, jnp.float32).reshape(1)

    grid = (pl.cdiv(B, TB), pl.cdiv(N, TR), pl.cdiv(N, TC))
    multi_col = grid[2] > 1

    cost = pl.CostEstimate(
        flops=2 * B * N * D + 4 * B * N,
        transcendentals=2 * B * N,
        bytes_accessed=4 * (B * N * N + B * N * D + D + 1),
    )

    return pl.pallas_call(
        _make_hetero_noise_kernel(multi_col),
        out_shape=jax.ShapeDtypeStruct((B, N, N), jnp.float32),
        grid_spec=pltpu.PrefetchScalarGridSpec(
            num_scalar_prefetch=0,
            grid=grid,
            in_specs=[
                pl.BlockSpec(memory_space=pltpu.MemorySpace.SMEM),        # b
                pl.BlockSpec((TB, TR, D), lambda i, r, c: (i, r, 0)),     # x rows
                pl.BlockSpec((1, D), lambda i, r, c: (0, 0)),             # w shared
            ],
            out_specs=pl.BlockSpec((TB, TR, TC), lambda i, r, c: (i, r, c)),
        ),
        compiler_params=pltpu.CompilerParams(
            dimension_semantics=("parallel", "parallel", "parallel"),
            vmem_limit_bytes=vmem_limit,
        ),
        cost_estimate=cost,
    )(b1, x.astype(jnp.float32), w2)


# --------------------------------------------------------------------------- #
# Reference + demo
# --------------------------------------------------------------------------- #
def _reference(x, w, b):
    mean = jnp.einsum("bnd,d->bn", x, w) + b
    noise_diag = jax.nn.softplus(mean) + LOWER_BOUND
    B, N = noise_diag.shape
    out = jnp.zeros((B, N, N), jnp.float32)
    idx = jnp.arange(N)
    return out.at[:, idx, idx].set(noise_diag)


if __name__ == "__main__":
    key = jax.random.PRNGKey(0)

    # Small shapes consistent with the module's forward: batch=2, n_points=8,
    # feature dim=32 (deterministic synthetic linear "noise_model" head).
    # Force the Pallas path (min_pallas_n=0) so the kernel itself is exercised.
    B, N, D = 2, 8, 32
    kx, kw = jax.random.split(key)
    x = jax.random.normal(kx, (B, N, D), dtype=jnp.float32)
    w = jax.random.normal(kw, (D,), dtype=jnp.float32) * 0.1
    b = jnp.float32(-0.5)

    out = jax.block_until_ready(heteroskedastic_noise(x, w, b, min_pallas_n=0))
    ref = _reference(x, w, b)
    assert out.shape == (B, N, N)
    assert jnp.allclose(out, ref, atol=1e-5, rtol=1e-5), "mismatch vs reference (small)"

    # Secondary check exercising the full-width row-slab tiled path.
    B2, N2, D2 = 2, 1024, 32
    x2 = jax.random.normal(jax.random.PRNGKey(1), (B2, N2, D2), dtype=jnp.float32)
    w2 = jax.random.normal(jax.random.PRNGKey(2), (D2,), dtype=jnp.float32) * 0.1
    out2 = jax.block_until_ready(heteroskedastic_noise(x2, w2, b))
    ref2 = _reference(x2, w2, b)
    assert out2.shape == (B2, N2, N2)
    assert jnp.allclose(out2, ref2, atol=1e-5, rtol=1e-5), "mismatch vs reference (tiled)"

    # TODO(synk): the `noise is not None` early-exit (diag_embed of a user
    # noise vector) and the `noise_indices` gather are not exposed as separate
    # entry points; both are degenerate cases of this kernel.  The arbitrary
    # user `noise_model` is synthesized here as a linear mean head (x @ w + b).
    print("KERNEL_OK")
</pallas_src>

<mosaic_0001>
module attributes {stable_mosaic.version = 11 : i64} {
  func.func @kernel(%arg0: i32, %arg1: i32, %arg2: i32, %arg3: memref<1xf32, #tpu.memory_space<smem>>, %arg4: memref<1x8x32xf32, #tpu.memory_space<vmem>>, %arg5: memref<1x32xf32, #tpu.memory_space<vmem>>, %arg6: memref<1x8x8xf32, #tpu.memory_space<vmem>>) attributes {dimension_semantics = [#tpu.dimension_semantics<parallel>, #tpu.dimension_semantics<parallel>, #tpu.dimension_semantics<parallel>], iteration_bounds = array<i64: 2, 1, 1>, scalar_prefetch = 0 : i64, scratch_operands = 0 : i64, tpu.core_type = #tpu.core_type<tc>, window_params = [{transform_indices = @transform_0, window_bounds = array<i64: 1>}, {transform_indices = @transform_1, window_bounds = array<i64: 1, 8, 32>}, {pipeline_mode = #tpu.pipeline_mode<synchronous>, transform_indices = @transform_2, window_bounds = array<i64: 1, 32>}, {transform_indices = @transform_3, window_bounds = array<i64: 1, 8, 8>}]} {
    %c8_i32 = arith.constant 8 : i32
    %0 = arith.muli %arg1, %c8_i32 : i32
    %c8_i32_0 = arith.constant 8 : i32
    %1 = arith.muli %arg2, %c8_i32_0 : i32
    %c0 = arith.constant 0 : index
    %c0_1 = arith.constant 0 : index
    %c0_2 = arith.constant 0 : index
    %2 = vector.load %arg4[%c0, %c0_1, %c0_2] : memref<1x8x32xf32, #tpu.memory_space<vmem>>, vector<1x8x32xf32>
    %c0_3 = arith.constant 0 : index
    %c0_4 = arith.constant 0 : index
    %3 = vector.load %arg5[%c0_3, %c0_4] : memref<1x32xf32, #tpu.memory_space<vmem>>, vector<1x32xf32>
    %4 = vector.shape_cast %3 : vector<1x32xf32> to vector<1x1x32xf32>
    %5 = vector.broadcast %4 : vector<1x1x32xf32> to vector<1x8x32xf32>
    %6 = arith.mulf %2, %5 : vector<1x8x32xf32>
    %cst = arith.constant dense<0.000000e+00> : vector<1x8xf32>
    %7 = vector.multi_reduction <add>, %6, %cst [2] : vector<1x8x32xf32> to vector<1x8xf32>
    %8 = vector.shape_cast %7 : vector<1x8xf32> to vector<1x8x1xf32>
    %c0_5 = arith.constant 0 : index
    %9 = memref.load %arg3[%c0_5] : memref<1xf32, #tpu.memory_space<smem>>
    %10 = vector.broadcast %9 : f32 to vector<1x8x1xf32>
    %11 = arith.addf %8, %10 : vector<1x8x1xf32>
    %cst_6 = arith.constant 0.000000e+00 : f32
    %12 = vector.broadcast %cst_6 : f32 to vector<1x8x1xf32>
    %13 = arith.maximumf %11, %12 : vector<1x8x1xf32>
    %14 = vector.broadcast %cst_6 : f32 to vector<1x8x1xf32>
    %15 = arith.subf %11, %14 : vector<1x8x1xf32>
    %16 = arith.cmpf one, %15, %15 : vector<1x8x1xf32>
    %17 = vector.broadcast %cst_6 : f32 to vector<1x8x1xf32>
    %18 = arith.addf %11, %17 : vector<1x8x1xf32>
    %19 = math.absf %15 : vector<1x8x1xf32>
    %cst_7 = arith.constant 0.000000e+00 : f32
    %20 = vector.broadcast %cst_7 : f32 to vector<1x8x1xf32>
    %21 = arith.subf %20, %19 : vector<1x8x1xf32>
    %22 = math.exp %21 : vector<1x8x1xf32>
    %23 = math.log1p %22 : vector<1x8x1xf32>
    %24 = arith.addf %13, %23 : vector<1x8x1xf32>
    %25 = arith.select %16, %18, %24 : vector<1x8x1xi1>, vector<1x8x1xf32>
    %cst_8 = arith.constant 9.99999974E-5 : f32
    %26 = vector.broadcast %cst_8 : f32 to vector<1x8x1xf32>
    %27 = arith.addf %25, %26 : vector<1x8x1xf32>
    %28 = tpu.iota {dimensions = array<i32: 0>} : vector<8x1xi32>
    %29 = vector.broadcast %0 : i32 to vector<8x1xi32>
    %30 = arith.addi %28, %29 : vector<8x1xi32>
    %31 = tpu.iota {dimensions = array<i32: 1>} : vector<1x8xi32>
    %32 = vector.broadcast %1 : i32 to vector<1x8xi32>
    %33 = arith.addi %31, %32 : vector<1x8xi32>
    %34 = vector.broadcast %30 : vector<8x1xi32> to vector<8x8xi32>
    %35 = vector.broadcast %33 : vector<1x8xi32> to vector<8x8xi32>
    %36 = arith.cmpi eq, %34, %35 : vector<8x8xi32>
    %37 = vector.shape_cast %36 : vector<8x8xi1> to vector<1x8x8xi1>
    %cst_9 = arith.constant 0.000000e+00 : f32
    %38 = vector.shape_cast %27 : vector<1x8x1xf32> to vector<1x8x1xf32>
    %39 = vector.broadcast %38 : vector<1x8x1xf32> to vector<1x8x8xf32>
    %40 = vector.broadcast %cst_9 : f32 to vector<1x8x8xf32>
    %41 = arith.select %37, %39, %40 : vector<1x8x8xi1>, vector<1x8x8xf32>
    %c0_10 = arith.constant 0 : index
    %c0_11 = arith.constant 0 : index
    %c0_12 = arith.constant 0 : index
    %42 = vector.load %arg6[%c0_10, %c0_11, %c0_12] : memref<1x8x8xf32, #tpu.memory_space<vmem>>, vector<1x8x8xf32>
    tpu.vector_store %arg6[%c0_10, %c0_11, %c0_12], %41 {strides = array<i32>} : memref<1x8x8xf32, #tpu.memory_space<vmem>>, vector<1x8x8xf32>,
    return
  }
  func.func @transform_0(%arg0: i32, %arg1: i32, %arg2: i32) -> i32 {
    %c0_i32 = arith.constant 0 : i32
    %c0_i32_0 = arith.constant 0 : i32
    return %c0_i32 : i32
  }
  func.func @transform_1(%arg0: i32, %arg1: i32, %arg2: i32) -> (i32, i32, i32) {
    %c0_i32 = arith.constant 0 : i32
    %c0_i32_0 = arith.constant 0 : i32
    return %arg0, %arg1, %c0_i32 : i32, i32, i32
  }
  func.func @transform_2(%arg0: i32, %arg1: i32, %arg2: i32) -> (i32, i32) {
    %c0_i32 = arith.constant 0 : i32
    %c0_i32_0 = arith.constant 0 : i32
    %c0_i32_1 = arith.constant 0 : i32
    return %c0_i32, %c0_i32_0 : i32, i32
  }
  func.func @transform_3(%arg0: i32, %arg1: i32, %arg2: i32) -> (i32, i32, i32) {
    %c0_i32 = arith.constant 0 : i32
    return %arg0, %arg1, %arg2 : i32, i32, i32
  }
}

</mosaic_0001>

<bundles_post_ra>
// kernel: tpu_custom_call.1
= control target key start
LH: loop header
LB: loop body
LE: loop exit
PB: predicated region body
PF: predicated region fallthrough
CT: control target
= control target key end

     0   :  { %s760_s0 = inlined_call_operand.<no memory space> [shape: f32[1], index: 0, kind: input, shape index: {}]   ;;  %s761_s1 = inlined_call_operand.hbm [shape: f32[2,8,32], index: 1, kind: input, shape index: {}]   ;;  %s762_s2 = inlined_call_operand.vmem [shape: f32[1,32], index: 2, kind: input, shape index: {}]   ;;  %s763_s3 = inlined_call_operand.hbm [shape: f32[2,8,8], index: 3, kind: output, shape index: {}]  }
   0x1   :  { %8 = sst [smem:[#allocation2]] %s760_s0 }
   0x2   :  { %9 = vsyncpa [#allocation4], 0 }
   0x3   :  { %11 = vsyncpa [#allocation4 + $0x1], 0 }
   0x4   :  { %12 = vsyncpa [#allocation5], 0 }
   0x5   :  { %14 = vsyncpa [#allocation5 + $0x1], 0  ;;  %s581_s14 = smov 0   ;;  %s583_s15 = smov 0  }
   0x6   :  { %s585_s16 = smov 0   ;;  %s587_s17 = smov 0  }
   0x7   :  { %s589_s18 = smov 0   ;;  %s591_s19 = smov 0  }
   0x8 LB: > { %s362_s0 = sadd.s32 4294967295, %s554_s19   ;;  %s363_s20 = sadd.s32 4294967294, %s554_s19   ;;  %s554_s19 = sphi %s591_s19, %s20_s19   ;;  %s550_s18 = sphi %s589_s18, %s779_s18   ;;  %s546_s17 = sphi %s587_s17, %s778_s17   ;;  %s542_s16 = sphi %s585_s16, %s777_s16   ;;  %s538_s15 = sphi %s583_s15, %s776_s15   ;;  %s534_s14 = sphi %s581_s14, %s775_s14  }
   0x9   : > { %s39_s21 = sadd.s32 1, %s550_s18  ;;  %s69_s22 = sadd.s32 1, %s542_s16 }
   0xa   : > { %p41_p0 = scmp.ge.s32.totalorder %s39_s21, 2  ;;  %p76_p1 = scmp.ne.s32.totalorder %s542_s16, %s538_s15 }
   0xb   : > { %p77_p2 = scmp.eq.s32.totalorder %s554_s19, 0  ;;  %p82_p3 = scmp.ne.s32.totalorder %s538_s15, %s534_s14 }
   0xc   : > { %s781_s21 = smov (%p41_p0, %s39_s21), 0  ;;  %p83_p5 = scmp.eq.s32.totalorder %s362_s0, 0 }
   0xd   : > { %p622_p4 = por %p77_p2, %p76_p1  ;;  %s64_s24 = ssub.s32 %s550_s18, %s781_s21 }
   0xe   : > { %p131_p6 = scmp.eq.s32.totalorder %s362_s0, 1  ;;  %p67_p7 = scmp.eq.s32.totalorder %s64_s24, 0 }
   0xf   : > { %p628_p8 = por %p83_p5, %p82_p3  ;;  %p137_p10 = scmp.eq.s32.totalorder %s363_s20, 1 }
  0x10   : > { %p632_p9 = por %p131_p6, %p76_p1  ;;  %p388_p13 = scmp.lt.s32.totalorder %s554_s19, 2 }
  0x11   : > { %s637_s27 = scalar_select %p67_p7, %s542_s16, %s69_s22  }
  0x12   : > { %s767_s26 = scalar_select %p632_p9, 1, 0 }
  0x13   : > { %p639_p11 = por %p137_p10, %p82_p3  ;;  %s163_s29 = sand.u32 1, %s542_s16  }
  0x14   : > { %s366_s30 = sshll.u32 %s163_s29, 3  ;;  %s367_s4 = sshll.u32 %s550_s18, 7 }
  0x15   : > { %s768_s28 = scalar_select %p639_p11, 1, 0 }
  0x16   : > { %s650_s7 = scalar_lea.hbm %s761_s1, %s367_s4  ;;  %s167_s8 = scalar_lea.vmem [#allocation3], %s366_s30 }
  0x17   : > { %s175_s9 = sshll.u32 %s167_s8, 4  ;;  %p656_p0 = pnand %p388_p13, %p622_p4  ;;  %s652_s9 = int_to_ptr.vmem [resolvable:$true] %s175_s9 }
  0x18   : > { %s164_s11 = scalar_lea.sflag [#allocation4], %s163_s29  ;;  %s442_s12 = scalar_lea.hbm %s650_s7, 128 }
  0x19   : > { %p443_p3 = scmp.ne.s32.totalorder %s650_s7, %s442_s12  ;;  %p444_p5 = pneg %p656_p0 }
  0x1a   : > { %s447_s20 = scalar_lea.hbm %s761_s1, 256  ;;  %p448_p4 = scmp.lt.u32.totalorder %s650_s7, %s761_s1 }
  0x1b   : > { %p445_p6 = pnand %p444_p5, %p443_p3  ;;  %p449_p10 = scmp.lt.u32.totalorder %s447_s20, %s442_s12 }
  0x1c   : > { %p451_p12 = scmp.lt.u32.totalorder %s442_s12, %s650_s7 }
  0x1d   : > { %p446_p7 = pneg %p445_p6  ;;  %p450_p13 = por %p449_p10, %p448_p4 }
  0x1f   : > { %p452_p1 = por %p451_p12, %p450_p13 }
  0x21   : > { %p453_p2 = pnand %p452_p1, %p446_p7 }
  0x23   : > { %456 = shalt.err (!%p453_p2)
}
  0x24   : > { %s457_s24 = scalar_lea.vmem %s652_s9, 128  ;;  %s556_s29 = smov [#allocation3]  }
  0x25   : > { %p458_p3 = scmp.ne.s32.totalorder %s652_s9, %s457_s24  ;;  %s462_s30 = sshll.u32 %s556_s29, 4  ;;  %s463_s30 = int_to_ptr.vmem [resolvable:$false] %s462_s30 }
  0x26   : > { %s464_s4 = scalar_lea.vmem %s463_s30, 256  ;;  %p465_p9 = scmp.lt.s32.totalorder %s652_s9, %s463_s30 }
  0x27   : > { %p460_p6 = pnand %p458_p3, %p444_p5  ;;  %p466_p4 = scmp.lt.s32.totalorder %s464_s4, %s457_s24 }
  0x29   : > { %p461_p11 = pneg %p460_p6  ;;  %p467_p10 = por %p466_p4, %p465_p9 }
  0x2b   : > { %p468_p12 = pnand %p467_p10, %p461_p11 }
  0x2d   : > { %471 = shalt.err (!%p468_p12)
}
  0x2e   : > { %383 = dma.hbm_to_vmem [thread:$0]  (!%p656_p0), %s650_s7, 128, %s652_s9, %s164_s11  }
  0x2f   : > { %p770_p1 = scmp.lt.s32.totalorder %s554_s19, 3  ;;  %p771_p2 = scmp.ge.s32.totalorder %s554_s19, 1 }
  0x31   : > { %p181_p5 = pnand %p771_p2, %p770_p1 }
  0x32   : > { %s692_s5 = sand.u32 (!%p181_p5), 1, %s538_s15  }
  0x33   : > { %184 = sbr.rel (%p181_p5) target bundleno = 261 (0x105), region = 32  ;;  %s369_s6 = sshll.u32 (!%p181_p5), %s692_s5, 3 }
  0x34   : > { %s187_s8 = scalar_lea.sflag (!%p181_p5), [#allocation4], %s692_s5  ;;  %s190_s10 = scalar_lea.vmem (!%p181_p5), [#allocation3], %s369_s6 }
  0x3a   : > { %525 = dma.done.wait (%p628_p8), %s187_s8, 128  }
  0x3b   : > { %527 = vsyncadd (%p628_p8), %s187_s8, 4294967168  ;;  %v215_v0 = vld [vmem:[%s190_s10] sm:$0xff]  ;;  %vm224_vm0 = vcmask 261120   ;;  %s228_s11 = sld [smem:[#allocation2]]  ;;  %v250_v15 = vlaneseq  ;;  %s373_s25 = sshll.u32 %s546_s17, 7  ;;  %vm260_vm4 = vcmask 64512  }
  0x3c   : > { %v371_v1 = vld [vmem:[%s762_s2] ss:$0 sm:$0xff]  ;;  %s212_s12 = scalar_lea.vmem [#allocation6], %s369_s6  ;;  %s711_s22 = scalar_lea.hbm %s763_s3, %s373_s25 }
  0x3d   : > { %v223_v2 = vmul.f32 %v371_v1, %v215_v0  ;;  %v251_v20 = vshrl.u32 %v250_v15, 7  ;;  %v255_v21 = vand.u32 127, %v250_v15  ;;  %s278_s13 = sshll.u32 %s212_s12, 4  ;;  %s263_s17 = scalar_lea.sflag [#allocation5], %s692_s5  ;;  %s713_s13 = int_to_ptr.vmem [resolvable:$true] %s278_s13 }
  0x3e   : > { %s472_s23 = scalar_lea.vmem %s713_s13, 128  ;;  %p772_p9 = scmp.ne.s32.totalorder %s767_s26, 0 }
  0x3f   : > { %v225_v3 = vsel %vm224_vm0, %v223_v2, 0.0  ;;  %vm258_vm3 = vcmp.eq.s32.totalorder %v251_v20, %v255_v21  ;;  %p473_p8 = scmp.ne.s32.totalorder %s713_s13, %s472_s23  ;;  %s557_s24 = smov [#allocation6]  }
  0x40   : > { %226 = vadd.xlane.f32.xlu0 %v225_v3  ;;  %s476_s29 = sshll.u32 %s557_s24, 4  ;;  %s477_s29 = int_to_ptr.vmem [resolvable:$false] %s476_s29 }
  0x41   : > { %v229_v4 = vstv %s228_s11  ;;  %p474_p11 = pnand %p473_p8, %p772_p9  ;;  %s478_s30 = scalar_lea.vmem %s477_s29, 256 }
  0x42   : > { %p479_p7 = scmp.lt.s32.totalorder %s713_s13, %s477_s29  ;;  %p480_p13 = scmp.lt.s32.totalorder %s478_s30, %s472_s23 }
  0x43   : > { %p475_p0 = pneg %p474_p11 }
  0x44   : > { %p481_p3 = por %p480_p13, %p479_p7 }
  0x46   : > { %p482_p6 = pnand %p481_p3, %p475_p0 }
  0xcd   : > { %v227_v5 = vpop.xlane.xlu0 %226 }
  0xce   : > { %v230_v6 = vadd.f32 %v229_v4, %v227_v5 }
  0xd0   : > { %v234_v7 = vand.u32 2147483647, %v230_v6  ;;  %v231_v19 = vmax.f32 %v230_v6, 0.0  ;;  %vm232_vm2 = vcmp.ne.f32.partialorder %v230_v6, %v230_v6 }
  0xd2   : > { %v235_v8 = vsub.f32 0.0, %v234_v7 }
  0xd4   : > { %v236_v9 = vmul.f32 1.442695, %v235_v8 }
  0xd6   : > { %438 = vpow2.f32 %v236_v9 }
  0xe0   : > { %v439_v10 = vpop.eup %438 }
  0xe1   : > { %v238_v11 = vadd.f32 1.0, %v439_v10  ;;  %v241_v12 = vmul.f32 -0.5, %v439_v10  ;;  %v244_v14 = vand.u32 2147483647, %v439_v10 }
  0xe3   : > { %440 = vlog2.f32 %v238_v11  ;;  %v242_v13 = vadd.f32 1.0, %v241_v12  ;;  %vm245_vm1 = vcmp.lt.f32.partialorder %v244_v14, 0.0004427343 }
  0xe5   : > { %v243_v18 = vmul.f32 %v439_v10, %v242_v13 }
  0xed   : > { %v441_v16 = vpop.eup %440 }
  0xee   : > { %v240_v17 = vmul.f32 0.6931472, %v441_v16 }
  0xf0   : > { %v246_v22 = vsel %vm245_vm1, %v243_v18, %v240_v17 }
  0xf1   : > { %v247_v23 = vadd.f32 %v246_v22, %v231_v19 }
  0xf3   : > { %v248_v24 = vsel %vm232_vm2, %v230_v6, %v247_v23 }
  0xf4   : > { %v249_v25 = vadd.f32 0.0001, %v248_v24 }
  0xf6   : > { %v259_v26 = vsel %vm258_vm3, %v249_v25, 0.0 }
  0xf7   : > { %261 = vst.msk [vmem:[%s212_s12] sm:$0xff] %vm260_vm4, %v259_v26 }
  0xf8   : > { %485 = shalt.err (!%p482_p6)
}
  0xf9   : > { %s486_s4 = scalar_lea.hbm %s711_s22, 128  ;;  %s490_s8 = scalar_lea.hbm %s763_s3, 256 }
  0xfa   : > { %p487_p4 = scmp.ne.s32.totalorder %s711_s22, %s486_s4  ;;  %p491_p1 = scmp.lt.u32.totalorder %s711_s22, %s763_s3 }
  0xfb   : > { %p492_p2 = scmp.lt.u32.totalorder %s490_s8, %s486_s4  ;;  %p494_p8 = scmp.lt.u32.totalorder %s486_s4, %s711_s22 }
  0xfc   : > { %p488_p10 = pnand %p487_p4, %p772_p9 }
  0xfd   : > { %p493_p5 = por %p492_p2, %p491_p1 }
  0xfe   : > { %p489_p12 = pneg %p488_p10 }
  0xff   : > { %p495_p11 = por %p494_p8, %p493_p5 }
 0x101   : > { %p496_p0 = pnand %p495_p11, %p489_p12 }
 0x103   : > { %499 = shalt.err (!%p496_p0)
}
 0x104   : > { %378 = dma.vmem_to_hbm [thread:$0]  (%p772_p9), %s713_s13, 128, %s711_s22, %s263_s17  }
 0x105 PF: > { %s290_s9 = sand.u32 1, %s534_s14   ;;  %p773_p7 = scmp.ne.s32.totalorder %s768_s28, 0 }
 0x106   : > { %p774_p13 = scmp.ge.s32.totalorder %s554_s19, 2  ;;  %s291_s11 = scalar_lea.sflag [#allocation5], %s290_s9 }
 0x108   : > { %p385_p3 = pnand %p774_p13, %p773_p7 }
 0x10a   : > { %529 = dma.done.wait (!%p385_p3), %s291_s11, 128  }
 0x10b   : > { %531 = vsyncadd (!%p385_p3), %s291_s11, 4294967168  ;;  %s20_s19 = sadd.s32 1, %s554_s19   ;;  %s775_s14 = smov %s538_s15 }
 0x10c   : > { %p17_p6 = scmp.ge.s32.totalorder %s20_s19, 4   ;;  %s776_s15 = smov %s542_s16 }
 0x10d   : > { %s777_s16 = smov %s637_s27  ;;  %s778_s17 = smov %s550_s18 }
 0x10e   : > { %s779_s18 = smov %s781_s21  ;;  %19 = sbr.rel (!%p17_p6) target bundleno = 8 (0x8), region = 77 }
 0x115   :  { %296 = vsyncpa [#allocation4], 1 }
 0x116   :  { %298 = vsyncpa [#allocation4 + $0x1], 1 }
 0x117   :  { %299 = vsyncpa [#allocation5], 1 }
 0x118   :  { %301 = vsyncpa [#allocation5 + $0x1], 1 }

</bundles_post_ra>
